<compile_context>
chip_gen: v7x
topology: tpu7x:2x2x1
jax: 0.10.0
libtpu: 0.0.40
codegen_flags: <defaults>
</compile_context>

<pallas_src>
import jax
import jax.numpy as jnp
from jax.experimental import pallas as pl
from jax.experimental.pallas import tpu as pltpu


_FAST_PATH_BYTES = 256 * 1024          # below this, just return the input (identity)
_VMEM_BUDGET_BYTES = 16 * 1024 * 1024  # budget for the 4 double-buffered tiles
_VMEM_LIMIT_BYTES = 32 * 1024 * 1024   # explicit scoped-VMEM limit (safe on v5e..v7x)


def _copy_kernel(x_ref, o_ref):
    # Hot path: whole-tile VMEM copy (vld -> vst), lane-dense, unmasked stores.
    o_ref[...] = x_ref[...]


def _pick_row_tile(M, N, itembytes):
    """Row tile from the VMEM budget; prefer exact divisors of M, sublane-aligned."""
    # 2 double-buffered inputs + 2 double-buffered outputs ~= 4 * tm * N * bytes.
    tm_budget = _VMEM_BUDGET_BYTES // (4 * N * itembytes)
    tm_budget = max(1, min(tm_budget, 1024, M))

    # Keep >= 2 grid steps when there are enough rows (engages both TCs on v7x).
    if tm_budget >= M and M > 16:
        tm_budget = (M + 1) // 2

    if tm_budget >= M:
        return M  # full extent is always a legal block shape

    row_mult = 8  # second-to-last dim multiple for 32-bit tiles (we copy 32-bit words)

    # Prefer the largest divisor of M that is <= budget and a multiple of row_mult:
    # exact division means every block is full -> no masked boundary stores.
    best_div = 0
    d = 1
    while d * d <= M:
        if M % d == 0:
            for cand in (d, M // d):
                if cand <= tm_budget and cand % row_mult == 0 and cand > best_div:
                    best_div = cand
        d += 1
    if best_div:
        return best_div

    # Fall back to a sublane-aligned tile (last block may be partial; Pallas masks it).
    tm = (tm_budget // row_mult) * row_mult
    return max(tm, row_mult) if M >= row_mult else M


def _pallas_copy_2d(x2):
    """Tiled HBM->HBM copy of a 2D array whose columns are the full block extent."""
    M, N = x2.shape
    tm = _pick_row_tile(M, N, x2.dtype.itemsize)

    grid = (pl.cdiv(M, tm),)
    return pl.pallas_call(
        _copy_kernel,
        out_shape=jax.ShapeDtypeStruct((M, N), x2.dtype),
        grid_spec=pltpu.PrefetchScalarGridSpec(
            num_scalar_prefetch=0,
            grid=grid,
            in_specs=[pl.BlockSpec((tm, N), lambda i: (i, 0))],
            out_specs=pl.BlockSpec((tm, N), lambda i: (i, 0)),
        ),
        compiler_params=pltpu.CompilerParams(
            dimension_semantics=("parallel",),
            vmem_limit_bytes=_VMEM_LIMIT_BYTES,
        ),
    )(x2)


def copy_expert(x, *, force_kernel=False):
    """Pallas TPU implementation of CopyExpert.forward (identity)."""
    if x.size == 0:
        return x

    orig_shape, orig_dtype = x.shape, x.dtype
    itemsize = x.dtype.itemsize
    nbytes = x.size * itemsize

    # Fast path: the module is a pure identity -> returning the input is exact and
    # skips 2x HBM traffic + kernel launch entirely.
    if not force_kernel and nbytes <= _FAST_PATH_BYTES:
        return x

    flat = x.reshape(-1)

    # Pack sub-32-bit payloads into uint32 words so every vld/vst carries full lanes.
    packed = False
    if itemsize in (1, 2) and x.dtype != jnp.bool_ and nbytes % 4 == 0:
        per_word = 4 // itemsize
        flat = jax.lax.bitcast_convert_type(flat.reshape(-1, per_word), jnp.uint32)
        packed = True

    S = flat.size

    # Lane-dense 2D view: largest multiple-of-128 lane width (<= 4096) dividing S.
    tn = 0
    for cand in (4096, 2048, 1024, 512, 256, 128):
        if S % cand == 0:
            tn = cand
            break
    if tn == 0:
        # Awkward total size (not a multiple of 128 words): the op is an identity,
        # so returning the input unchanged is exact (preferred short-circuit).
        return x

    x2 = flat.reshape(S // tn, tn)
    out2 = _pallas_copy_2d(x2)

    out_flat = out2.reshape(-1)
    if packed:
        out_flat = jax.lax.bitcast_convert_type(out_flat, orig_dtype).reshape(-1)
    return out_flat.reshape(orig_shape)


if __name__ == "__main__":
    key = jax.random.PRNGKey(0)

    # 1) Small "input_ids"-like tensor: batch=2, seq=8 (int32) -> identity fast path.
    input_ids = jax.random.randint(key, (2, 8), minval=0, maxval=1000, dtype=jnp.int32)
    out = copy_expert(input_ids)
    jax.block_until_ready(out)
    assert out.shape == input_ids.shape and out.dtype == input_ids.dtype
    assert bool(jnp.all(out == input_ids))

    # 2) Small float tensor, forced through the Pallas kernel path for correctness.
    x_f = jax.random.normal(jax.random.PRNGKey(1), (2, 4, 16, 16), dtype=jnp.float32)
    out_f = copy_expert(x_f, force_kernel=True)
    jax.block_until_ready(out_f)
    assert out_f.shape == x_f.shape and out_f.dtype == x_f.dtype
    assert bool(jnp.all(out_f == x_f))

    # 3) Larger f32 tensor: exercises the lane-dense, budget-tiled, multi-step grid path.
    x_big = jax.random.normal(jax.random.PRNGKey(2), (512, 2048), dtype=jnp.float32)
    out_big = copy_expert(x_big)
    jax.block_until_ready(out_big)
    assert out_big.shape == x_big.shape and bool(jnp.all(out_big == x_big))

    # 4) bf16 tensor: exercises the uint32 packing path.
    x_bf = jax.random.normal(jax.random.PRNGKey(3), (256, 1024), dtype=jnp.float32)
    x_bf = x_bf.astype(jnp.bfloat16)
    out_bf = copy_expert(x_bf)
    jax.block_until_ready(out_bf)
    assert out_bf.shape == x_bf.shape and out_bf.dtype == x_bf.dtype
    assert bool(jnp.all(out_bf == x_bf))

    # 5) Odd row count (non-power-of-2 rows): exercises divisor-based row tiling.
    x_odd = jax.random.normal(jax.random.PRNGKey(4), (96, 1152), dtype=jnp.float32)
    out_odd = copy_expert(x_odd, force_kernel=True)
    jax.block_until_ready(out_odd)
    assert out_odd.shape == x_odd.shape and bool(jnp.all(out_odd == x_odd))

    print("KERNEL_OK")
</pallas_src>

<mosaic_0001>
module attributes {stable_mosaic.version = 11 : i64} {
  func.func @_copy_kernel(%arg0: i32, %arg1: memref<1x2048xf32, #tpu.memory_space<vmem>>, %arg2: memref<1x2048xf32, #tpu.memory_space<vmem>>) attributes {dimension_semantics = [#tpu.dimension_semantics<parallel>], iteration_bounds = array<i64: 1>, scalar_prefetch = 0 : i64, scratch_operands = 0 : i64, tpu.core_type = #tpu.core_type<tc>, window_params = [{transform_indices = @transform_0, window_bounds = array<i64: 1, 2048>}, {transform_indices = @transform_1, window_bounds = array<i64: 1, 2048>}]} {
    %c0 = arith.constant 0 : index
    %c0_0 = arith.constant 0 : index
    %0 = vector.load %arg1[%c0, %c0_0] : memref<1x2048xf32, #tpu.memory_space<vmem>>, vector<1x2048xf32>
    %c0_1 = arith.constant 0 : index
    %c0_2 = arith.constant 0 : index
    %1 = vector.load %arg2[%c0_1, %c0_2] : memref<1x2048xf32, #tpu.memory_space<vmem>>, vector<1x2048xf32>
    tpu.vector_store %arg2[%c0_1, %c0_2], %0 {strides = array<i32>} : memref<1x2048xf32, #tpu.memory_space<vmem>>, vector<1x2048xf32>,
    return
  }
  func.func @transform_0(%arg0: i32) -> (i32, i32) {
    %c0_i32 = arith.constant 0 : i32
    %c0_i32_0 = arith.constant 0 : i32
    return %arg0, %c0_i32 : i32, i32
  }
  func.func @transform_1(%arg0: i32) -> (i32, i32) {
    %c0_i32 = arith.constant 0 : i32
    %c0_i32_0 = arith.constant 0 : i32
    return %arg0, %c0_i32 : i32, i32
  }
}

</mosaic_0001>

<bundles_post_ra>
// kernel: tpu_custom_call.1
= control target key start
LH: loop header
LB: loop body
LE: loop exit
PB: predicated region body
PF: predicated region fallthrough
CT: control target
= control target key end

     0   :  { %6 = vsyncpa [#allocation3], 0  ;;  %s126_s0 = inlined_call_operand.hbm [shape: f32[1,2048], index: 0, kind: input, shape index: {}]   ;;  %s127_s1 = inlined_call_operand.hbm [shape: f32[1,2048], index: 1, kind: output, shape index: {}]  }
   0x1   :  { %7 = vsyncpa [#allocation4], 0  ;;  %s90_s6 = smov [#allocation2]   ;;  %s42_s10 = scalar_lea.hbm %s126_s0, 256 }
   0x2   :  { %s14_s7 = sshll.u32 %s90_s6, 4  ;;  %p43_p0 = scmp.ne.s32.totalorder %s126_s0, %s42_s10  ;;  %s15_s7 = int_to_ptr.vmem [resolvable:$true] %s14_s7 }
   0x3   :  { %p46_p1 = scmp.lt.u32.totalorder %s42_s10, %s126_s0 }
   0x5   :  { %p48_p2 = pnand %p46_p1, %p43_p0 }
   0x7   :  { %51 = shalt.err (!%p48_p2)
}
   0x8   :  { %s52_s15 = scalar_lea.vmem %s15_s7, 256  ;;  %p57_p4 = scmp.lt.s32.totalorder %s15_s7, %s15_s7 }
   0x9   :  { %p53_p3 = scmp.ne.s32.totalorder %s15_s7, %s52_s15  ;;  %p58_p5 = scmp.lt.s32.totalorder %s52_s15, %s52_s15 }
   0xb   :  { %p59_p6 = por %p58_p5, %p57_p4 }
   0xd   :  { %p60_p7 = pnand %p59_p6, %p53_p3 }
   0xf   :  { %63 = shalt.err (!%p60_p7)
}
  0x10   :  { %17 = dma.hbm_to_vmem [thread:$0]  %s126_s0, 256, %s15_s7, [#allocation3]  }
  0x11   :  { %86 = dma.done.wait [#allocation3], 256  }
  0x12   :  { %87 = vsyncadd [#allocation3], 4294967040  ;;  %s91_s18 = smov [#allocation5]   ;;  %v21_v0 = vld [vmem:[#allocation2] sm:$0xff]  ;;  %v22_v1 = vld [vmem:[#allocation2 + $0x8] sm:$0xff] }
  0x13   :  { %s31_s19 = sshll.u32 %s91_s18, 4  ;;  %23 = vst [vmem:[#allocation5] sm:$0xff] %v21_v0  ;;  %24 = vst [vmem:[#allocation5 + $0x8] sm:$0xff] %v22_v1  ;;  %s32_s19 = int_to_ptr.vmem [resolvable:$true] %s31_s19 }
  0x14   :  { %s64_s20 = scalar_lea.vmem %s32_s19, 256  ;;  %p69_p9 = scmp.lt.s32.totalorder %s32_s19, %s32_s19 }
  0x15   :  { %p65_p8 = scmp.ne.s32.totalorder %s32_s19, %s64_s20  ;;  %p70_p10 = scmp.lt.s32.totalorder %s64_s20, %s64_s20 }
  0x17   :  { %p71_p11 = por %p70_p10, %p69_p9 }
  0x19   :  { %p72_p12 = pnand %p71_p11, %p65_p8 }
  0x1b   :  { %75 = shalt.err (!%p72_p12)
}
  0x1c   :  { %s76_s0 = scalar_lea.hbm %s127_s1, 256 }
  0x1d   :  { %p77_p13 = scmp.ne.s32.totalorder %s127_s1, %s76_s0  ;;  %p80_p0 = scmp.lt.u32.totalorder %s76_s0, %s127_s1 }
  0x1f   :  { %p82_p1 = pnand %p80_p0, %p77_p13 }
  0x21   :  { %85 = shalt.err (!%p82_p1)
}
  0x22   :  { %34 = dma.vmem_to_hbm [thread:$0]  %s32_s19, 256, %s127_s1, [#allocation4]  }
  0x23   :  { %88 = dma.done.wait [#allocation4], 256  }
  0x24   :  { %89 = vsyncadd [#allocation4], 4294967040 }
  0x25   :  { %38 = vsyncpa [#allocation3], 1 }
  0x26   :  { %39 = vsyncpa [#allocation4], 1 }

</bundles_post_ra>
